<compile_context>
chip_gen: v6e
topology: v6e:2x2x1
jax: 0.10.0
libtpu: 0.0.40
codegen_flags: <defaults>
</compile_context>

<pallas_src>
import functools

import jax
import jax.numpy as jnp
from jax.experimental import pallas as pl
from jax.experimental.pallas import tpu as pltpu


def _pow_one_minus(p, gamma):
    """(1 - p)^gamma, specialized for common gamma, clamped for numeric safety."""
    if gamma == 0.0:
        return jnp.ones_like(p)
    x = jnp.maximum(1.0 - p, 0.0)
    if gamma == 0.5:
        return jnp.sqrt(x)
    if gamma == 1.0:
        return x
    if gamma == 2.0:
        return x * x
    return jnp.power(x, gamma)


def _nfl_kernel(logits_ref, labels_ref, out_ref, *, n_rows, gamma, final_scale):
    core = pl.program_id(0)          # "parallel" axis (TensorCore split on v7x)
    step = pl.program_id(1)          # "arbitrary" axis (batch tiles, accumulated)
    steps = pl.num_programs(1)

    @pl.when(step == 0)
    def _init():
        out_ref[0, 0] = jnp.float32(0.0)

    logits = logits_ref[...].astype(jnp.float32)      # (TILE_N, C), upcast in VMEM
    labels = labels_ref[...]                           # (TILE_N, 1) int32
    tn, nc = logits.shape

    # log-softmax over the class (lane) axis; exp(shifted) is reused for the
    # softmax probabilities so there is only ONE full-tile exp on the EUP.
    m = jnp.max(logits, axis=1, keepdims=True)
    shifted = logits - m
    e = jnp.exp(shifted)
    sumexp = jnp.sum(e, axis=1, keepdims=True)
    logpt = shifted - jnp.log(sumexp)                  # (TILE_N, C)

    # Focal-loss normalizer: sum_c -(1 - p_c)^gamma * logp_c.
    # gamma == 0 (module default) fast path: skip probabilities / focal weight
    # entirely; negation hoisted onto the reduced (TILE_N, 1) column.
    if gamma == 0.0:
        normalizor = -jnp.sum(logpt, axis=1, keepdims=True)
    else:
        pt = e * pl.reciprocal(sumexp, approx=False)   # softmax probabilities
        w = _pow_one_minus(pt, gamma)
        normalizor = -jnp.sum(w * logpt, axis=1, keepdims=True)

    # Gather the label column: select-then-reduce (no one-hot cast/multiply).
    col = jax.lax.broadcasted_iota(jnp.int32, (tn, nc), 1)
    logpt_y = jnp.sum(jnp.where(col == labels, logpt, 0.0), axis=1,
                      keepdims=True)                   # (TILE_N, 1)

    if gamma == 0.0:
        loss = -logpt_y
    else:
        pt_y = jnp.exp(logpt_y)
        loss = -_pow_one_minus(pt_y, gamma) * logpt_y
    # Exact reciprocal: this division scales the returned loss directly.
    loss = loss * pl.reciprocal(normalizor, approx=False)

    # Mask rows beyond N (ragged last tile / clamped duplicate tile on the
    # v7x second core). jnp.where (not multiply) so NaN/inf never leaks.
    row = jax.lax.broadcasted_iota(jnp.int32, (tn, 1), 0)
    g_row = (core * steps + step) * tn + row
    loss = jnp.where(g_row < n_rows, loss, 0.0)

    out_ref[0, 0] += jnp.sum(loss)

    @pl.when(step == steps - 1)
    def _finalize():
        # scale and 1/N folded into one multiply, applied once per core.
        out_ref[0, 0] = out_ref[0, 0] * jnp.float32(final_scale)


def _num_tensorcores():
    """Best-effort TensorCore count: 2 only on v7x (v5e/v6e are single-TC)."""
    try:
        kind = jax.devices()[0].device_kind.lower()
    except Exception:  # pragma: no cover - defensive
        return 1
    return 2 if "v7" in kind else 1


def normalized_focal_loss(logits, labels, *, num_classes, scale=1.0, gamma=0.0,
                          reduction="mean", tile_n=None):
    """Pallas TPU NormalizedFocalLoss (weight=None). Returns a scalar."""
    n, c = logits.shape
    assert c == num_classes
    # TODO(synk): per-class `weight` attachment not implemented (weight=None path only).
    labels2d = labels.astype(jnp.int32).reshape(n, 1)

    # ---- tile sizing from the TOTAL VMEM footprint ------------------------
    # 2x double-buffered native-dtype logits block + the lane-padded f32
    # temporaries the reductions force Mosaic to materialize (logits.astype,
    # shifted, e, logpt, [pt, w,] masked product) + the lane-padded label
    # column.  Budget ~28 MiB so the declared limit stays well under the
    # 64 MiB physical VMEM of a v7x TensorCore with headroom for scratch.
    itemsize = jnp.dtype(logits.dtype).itemsize
    c_pad = max(128, ((c + 127) // 128) * 128)       # lane padding in VMEM
    f32_temps = 5 if gamma == 0.0 else 7
    bytes_per_row = (2 * c_pad * itemsize            # double-buffered input
                     + f32_temps * c_pad * 4         # in-kernel f32 working set
                     + 2 * 128 * 4)                  # (tile_n,1) label block x2
    vmem_budget = 28 * 1024 * 1024

    if tile_n is None:
        tile_n = max(8, vmem_budget // bytes_per_row)
    tile_n = int(tile_n)
    if tile_n >= n:
        tile_n = n                                   # single tile, no padding rules
    else:
        tile_n = max(8, (tile_n // 8) * 8)           # sublane-aligned partial tiles

    num_tiles = -(-n // tile_n)

    # Split the batch across the two v7x TensorCores when there is enough
    # work; on single-TC chips (v5e/v6e) keep a plain serial tile loop with a
    # trivial index_map (no clamp, no duplicated tile).
    num_cores = 2 if (_num_tensorcores() == 2 and num_tiles >= 2) else 1
    tiles_per_core = -(-num_tiles // num_cores)

    if num_cores == 1:
        def _tile_idx(core, step):
            del core
            return step
    else:
        def _tile_idx(core, step):
            # Clamp so a ragged second core never indexes past the last
            # block; its duplicated rows are masked out inside the kernel.
            return jnp.minimum(core * tiles_per_core + step, num_tiles - 1)

    final_scale = float(scale) / n if reduction == "mean" else float(scale)
    kernel = functools.partial(_nfl_kernel, n_rows=n, gamma=float(gamma),
                               final_scale=final_scale)

    vmem_needed = tile_n * bytes_per_row
    # Cap at 48 MiB: always valid on v7x (64 MiB physical) and leaves headroom.
    vmem_limit = int(min(48 * 1024 * 1024,
                         max(vmem_needed + 8 * 1024 * 1024, 16 * 1024 * 1024)))

    partials = pl.pallas_call(
        kernel,
        out_shape=jax.ShapeDtypeStruct((num_cores, 1), jnp.float32),
        grid=(num_cores, tiles_per_core),
        in_specs=[
            # Native dtype DMA'd straight from HBM (no host-side f32 cast).
            pl.BlockSpec((tile_n, c), lambda core, step: (_tile_idx(core, step), 0)),
            pl.BlockSpec((tile_n, 1), lambda core, step: (_tile_idx(core, step), 0)),
        ],
        out_specs=pl.BlockSpec((1, 1), lambda core, step: (core, 0),
                               memory_space=pltpu.MemorySpace.SMEM),
        compiler_params=pltpu.CompilerParams(
            dimension_semantics=("parallel", "arbitrary"),
            vmem_limit_bytes=vmem_limit),
    )(logits, labels2d)
    return jnp.sum(partials)


def _reference(logits, labels, *, num_classes, scale=1.0, gamma=0.0,
               reduction="mean"):
    # Pure-JAX reference mirroring the PyTorch module (weight=None).
    del num_classes
    logpt = jax.nn.log_softmax(logits.astype(jnp.float32), axis=1)
    pt_all = jnp.exp(logpt)
    normalizor = jnp.sum(-1.0 * jnp.maximum(1.0 - pt_all, 0.0) ** gamma * logpt,
                         axis=1)
    logpt_y = jnp.take_along_axis(logpt, labels[:, None], axis=1)[:, 0]
    pt_y = jnp.exp(logpt_y)
    loss = -1.0 * jnp.maximum(1.0 - pt_y, 0.0) ** gamma * logpt_y
    loss = scale * loss / normalizor
    return jnp.mean(loss) if reduction == "mean" else jnp.sum(loss)


if __name__ == "__main__":
    key = jax.random.PRNGKey(0)
    k1, k2, k3, k4, k5, k6 = jax.random.split(key, 6)

    # --- test 1: small batch, gamma=0.5 (single tile, single core path) ----
    batch, num_classes = 8, 16
    scale, gamma = 1.0, 0.5
    logits = jax.random.normal(k1, (batch, num_classes), dtype=jnp.float32)
    labels = jax.random.randint(k2, (batch,), 0, num_classes, dtype=jnp.int32)

    out = normalized_focal_loss(logits, labels, num_classes=num_classes,
                                scale=scale, gamma=gamma)
    out = jax.block_until_ready(out)
    ref = _reference(logits, labels, num_classes=num_classes,
                     scale=scale, gamma=gamma)
    assert jnp.allclose(out, ref, rtol=1e-4, atol=1e-5), (out, ref)

    # --- test 2: ragged batch, multi-tile grid, gamma=0 fast path ----------
    batch2 = 21
    scale2, gamma2 = 2.0, 0.0   # module defaults: gamma=0
    logits2 = jax.random.normal(k3, (batch2, num_classes), dtype=jnp.float32)
    labels2 = jax.random.randint(k4, (batch2,), 0, num_classes, dtype=jnp.int32)

    out2 = normalized_focal_loss(logits2, labels2, num_classes=num_classes,
                                 scale=scale2, gamma=gamma2, tile_n=8)
    out2 = jax.block_until_ready(out2)
    ref2 = _reference(logits2, labels2, num_classes=num_classes,
                      scale=scale2, gamma=gamma2)
    assert jnp.allclose(out2, ref2, rtol=1e-4, atol=1e-5), (out2, ref2)

    # --- test 3: multi-tile ragged batch, gamma=2, sum reduction -----------
    batch3 = 300
    scale3, gamma3 = 0.5, 2.0
    logits3 = jax.random.normal(k5, (batch3, num_classes), dtype=jnp.float32)
    labels3 = jax.random.randint(k6, (batch3,), 0, num_classes, dtype=jnp.int32)

    out3 = normalized_focal_loss(logits3, labels3, num_classes=num_classes,
                                 scale=scale3, gamma=gamma3, reduction="sum",
                                 tile_n=128)
    out3 = jax.block_until_ready(out3)
    ref3 = _reference(logits3, labels3, num_classes=num_classes,
                      scale=scale3, gamma=gamma3, reduction="sum")
    assert jnp.allclose(out3, ref3, rtol=1e-4, atol=1e-4), (out3, ref3)

    print("KERNEL_OK")
</pallas_src>

<mosaic_0001>
module attributes {stable_mosaic.version = 11 : i64} {
  func.func @_nfl_kernel(%arg0: i32, %arg1: i32, %arg2: memref<8x16xf32, #tpu.memory_space<vmem>>, %arg3: memref<8x1xi32, #tpu.memory_space<vmem>>, %arg4: memref<1x1xf32, #tpu.memory_space<smem>>) attributes {dimension_semantics = [#tpu.dimension_semantics<parallel>, #tpu.dimension_semantics<arbitrary>], iteration_bounds = array<i64: 1, 1>, scalar_prefetch = 0 : i64, scratch_operands = 0 : i64, tpu.core_type = #tpu.core_type<tc>, window_params = [{transform_indices = @transform_0, window_bounds = array<i64: 8, 16>}, {transform_indices = @transform_1, window_bounds = array<i64: 8, 1>}, {transform_indices = @transform_2, window_bounds = array<i64: 1, 1>}]} {
    %c0_i32 = arith.constant 0 : i32
    %0 = arith.cmpi eq, %arg1, %c0_i32 : i32
    %1 = arith.extui %0 : i1 to i32
    %c0_i32_0 = arith.constant 0 : i32
    %2 = arith.cmpi ne, %1, %c0_i32_0 : i32
    scf.if %2 {
      %cst_23 = arith.constant 0.000000e+00 : f32
      %c0_24 = arith.constant 0 : index
      %c0_25 = arith.constant 0 : index
      %66 = memref.load %arg4[%c0_24, %c0_25] : memref<1x1xf32, #tpu.memory_space<smem>>
      memref.store %cst_23, %arg4[%c0_24, %c0_25] : memref<1x1xf32, #tpu.memory_space<smem>>
    } else {
    }
    %c0 = arith.constant 0 : index
    %c0_1 = arith.constant 0 : index
    %3 = vector.load %arg2[%c0, %c0_1] : memref<8x16xf32, #tpu.memory_space<vmem>>, vector<8x16xf32>
    %c0_2 = arith.constant 0 : index
    %c0_3 = arith.constant 0 : index
    %4 = vector.load %arg3[%c0_2, %c0_3] : memref<8x1xi32, #tpu.memory_space<vmem>>, vector<8x1xi32>
    %cst = arith.constant dense<0xFF800000> : vector<8xf32>
    %5 = vector.multi_reduction <maximumf>, %3, %cst [1] : vector<8x16xf32> to vector<8xf32>
    %6 = vector.shape_cast %5 : vector<8xf32> to vector<8x1xf32>
    %7 = vector.broadcast %6 : vector<8x1xf32> to vector<8x16xf32>
    %8 = arith.subf %3, %7 : vector<8x16xf32>
    %9 = math.exp %8 : vector<8x16xf32>
    %cst_4 = arith.constant dense<0.000000e+00> : vector<8xf32>
    %10 = vector.multi_reduction <add>, %9, %cst_4 [1] : vector<8x16xf32> to vector<8xf32>
    %11 = vector.shape_cast %10 : vector<8xf32> to vector<8x1xf32>
    %12 = math.log %11 : vector<8x1xf32>
    %13 = vector.broadcast %12 : vector<8x1xf32> to vector<8x16xf32>
    %14 = arith.subf %8, %13 : vector<8x16xf32>
    %15 = tpu.reciprocal %11 : vector<8x1xf32> -> vector<8x1xf32>
    %16 = vector.broadcast %15 : vector<8x1xf32> to vector<8x16xf32>
    %17 = arith.mulf %9, %16 : vector<8x16xf32>
    %cst_5 = arith.constant 1.000000e+00 : f32
    %18 = vector.broadcast %cst_5 : f32 to vector<8x16xf32>
    %19 = arith.subf %18, %17 : vector<8x16xf32>
    %cst_6 = arith.constant 0.000000e+00 : f32
    %20 = vector.broadcast %cst_6 : f32 to vector<8x16xf32>
    %21 = arith.maximumf %19, %20 : vector<8x16xf32>
    %22 = math.sqrt %21 : vector<8x16xf32>
    %23 = arith.mulf %22, %14 : vector<8x16xf32>
    %cst_7 = arith.constant dense<0.000000e+00> : vector<8xf32>
    %24 = vector.multi_reduction <add>, %23, %cst_7 [1] : vector<8x16xf32> to vector<8xf32>
    %25 = vector.shape_cast %24 : vector<8xf32> to vector<8x1xf32>
    %cst_8 = arith.constant 0.000000e+00 : f32
    %26 = vector.broadcast %cst_8 : f32 to vector<8x1xf32>
    %27 = arith.subf %26, %25 : vector<8x1xf32>
    %28 = tpu.iota {dimensions = array<i32: 1>} : vector<8x16xi32>
    %29 = vector.broadcast %4 : vector<8x1xi32> to vector<8x16xi32>
    %30 = arith.cmpi eq, %28, %29 : vector<8x16xi32>
    %cst_9 = arith.constant 0.000000e+00 : f32
    %31 = vector.broadcast %cst_9 : f32 to vector<8x16xf32>
    %32 = arith.select %30, %14, %31 : vector<8x16xi1>, vector<8x16xf32>
    %cst_10 = arith.constant dense<0.000000e+00> : vector<8xf32>
    %33 = vector.multi_reduction <add>, %32, %cst_10 [1] : vector<8x16xf32> to vector<8xf32>
    %34 = vector.shape_cast %33 : vector<8xf32> to vector<8x1xf32>
    %35 = math.exp %34 : vector<8x1xf32>
    %cst_11 = arith.constant 1.000000e+00 : f32
    %36 = vector.broadcast %cst_11 : f32 to vector<8x1xf32>
    %37 = arith.subf %36, %35 : vector<8x1xf32>
    %cst_12 = arith.constant 0.000000e+00 : f32
    %38 = vector.broadcast %cst_12 : f32 to vector<8x1xf32>
    %39 = arith.maximumf %37, %38 : vector<8x1xf32>
    %40 = math.sqrt %39 : vector<8x1xf32>
    %cst_13 = arith.constant 0.000000e+00 : f32
    %41 = vector.broadcast %cst_13 : f32 to vector<8x1xf32>
    %42 = arith.subf %41, %40 : vector<8x1xf32>
    %43 = arith.mulf %42, %34 : vector<8x1xf32>
    %44 = tpu.reciprocal %27 : vector<8x1xf32> -> vector<8x1xf32>
    %45 = arith.mulf %43, %44 : vector<8x1xf32>
    %46 = tpu.iota {dimensions = array<i32: 0>} : vector<8x1xi32>
    %c1_i32 = arith.constant 1 : i32
    %47 = arith.muli %arg0, %c1_i32 : i32
    %48 = arith.addi %47, %arg1 : i32
    %c8_i32 = arith.constant 8 : i32
    %49 = arith.muli %48, %c8_i32 : i32
    %50 = vector.broadcast %49 : i32 to vector<8x1xi32>
    %51 = arith.addi %50, %46 : vector<8x1xi32>
    %c8_i32_14 = arith.constant 8 : i32
    %52 = vector.broadcast %c8_i32_14 : i32 to vector<8x1xi32>
    %53 = arith.cmpi slt, %51, %52 : vector<8x1xi32>
    %cst_15 = arith.constant 0.000000e+00 : f32
    %54 = vector.broadcast %cst_15 : f32 to vector<8x1xf32>
    %55 = arith.select %53, %45, %54 : vector<8x1xi1>, vector<8x1xf32>
    %c0_16 = arith.constant 0 : index
    %c0_17 = arith.constant 0 : index
    %56 = memref.load %arg4[%c0_16, %c0_17] : memref<1x1xf32, #tpu.memory_space<smem>>
    %57 = vector.shape_cast %55 : vector<8x1xf32> to vector<1x8x1xf32>
    %cst_18 = arith.constant dense<0.000000e+00> : vector<1xf32>
    %58 = vector.multi_reduction <add>, %57, %cst_18 [1, 2] : vector<1x8x1xf32> to vector<1xf32>
    %59 = vector.shape_cast %58 : vector<1xf32> to vector<1x1x1xf32>
    %60 = vector.extract %59[0, 0, 0] : f32 from vector<1x1x1xf32>
    %61 = arith.addf %56, %60 : f32
    %c0_19 = arith.constant 0 : index
    %c0_20 = arith.constant 0 : index
    %62 = memref.load %arg4[%c0_19, %c0_20] : memref<1x1xf32, #tpu.memory_space<smem>>
    memref.store %61, %arg4[%c0_19, %c0_20] : memref<1x1xf32, #tpu.memory_space<smem>>
    %c0_i32_21 = arith.constant 0 : i32
    %63 = arith.cmpi eq, %arg1, %c0_i32_21 : i32
    %64 = arith.extui %63 : i1 to i32
    %c0_i32_22 = arith.constant 0 : i32
    %65 = arith.cmpi ne, %64, %c0_i32_22 : i32
    scf.if %65 {
      %c0_23 = arith.constant 0 : index
      %c0_24 = arith.constant 0 : index
      %66 = memref.load %arg4[%c0_23, %c0_24] : memref<1x1xf32, #tpu.memory_space<smem>>
      %cst_25 = arith.constant 1.250000e-01 : f32
      %67 = arith.mulf %66, %cst_25 : f32
      %c0_26 = arith.constant 0 : index
      %c0_27 = arith.constant 0 : index
      %68 = memref.load %arg4[%c0_26, %c0_27] : memref<1x1xf32, #tpu.memory_space<smem>>
      memref.store %67, %arg4[%c0_26, %c0_27] : memref<1x1xf32, #tpu.memory_space<smem>>
    } else {
    }
    return
  }
  func.func @transform_0(%arg0: i32, %arg1: i32) -> (i32, i32) {
    %c0_i32 = arith.constant 0 : i32
    %c0_i32_0 = arith.constant 0 : i32
    return %arg1, %c0_i32 : i32, i32
  }
  func.func @transform_1(%arg0: i32, %arg1: i32) -> (i32, i32) {
    %c0_i32 = arith.constant 0 : i32
    %c0_i32_0 = arith.constant 0 : i32
    return %arg1, %c0_i32 : i32, i32
  }
  func.func @transform_2(%arg0: i32, %arg1: i32) -> (i32, i32) {
    %c0_i32 = arith.constant 0 : i32
    %c0_i32_0 = arith.constant 0 : i32
    return %arg0, %c0_i32 : i32, i32
  }
}

</mosaic_0001>

<bundles_post_ra>
// kernel: tpu_custom_call.1
= control target key start
LH: loop header
LB: loop body
LE: loop exit
PB: predicated region body
PF: predicated region fallthrough
CT: control target
= control target key end

     0   :  { %vm20_vm0 = vcmask 130048   ;;  %s177_s0 = inlined_call_operand.vmem [shape: f32[8,16], index: 0, kind: input, shape index: {}]   ;;  %s178_s1 = inlined_call_operand.vmem [shape: s32[8,1], index: 1, kind: input, shape index: {}]   ;;  %s179_s2 = inlined_call_operand.hbm [shape: f32[1,1], index: 2, kind: output, shape index: {}]  }
   0x1   :  { %v18_v0 = vld [vmem:[%s177_s0] sm:$0xff] }
   0x2   :  { %7 = vsyncpa [#allocation3], 0  ;;  %v21_v1 = vsel %vm20_vm0, %v18_v0, -inf  ;;  %v19_v2 = vld [vmem:[%s178_s1] sm:$0xff]  ;;  %v147_v3 = vmov 0   ;;  %v49_v10 = vlaneseq  ;;  %vm83_vm6 = vcmask 7168  }
   0x3   :  { %22 = vmax.xlane.f32.xlu0 %v21_v1  ;;  %121 = vset.pattern.permute.xlu1 %v147_v3  ;;  %s148_s13 = smov [#allocation2]  }
   0x4   :  { %122 = vset.pattern.permute.xlu0 %v147_v3  ;;  %52 = vperm.xlu1 %121, %v19_v2   ;;  %v50_v11 = vand.u32 127, %v49_v10 }
  0x7f   :  { %v53_v12 = vpop.permute.xlu1 %52 }
  0x80   :  { %vm54_vm1 = vcmp.eq.s32.totalorder %v50_v11, %v53_v12 }
  0x8c   :  { %v23_v4 = vpop.xlane.xlu0 %22 }
  0x8d   :  { %v24_v5 = vsub.f32 %v18_v0, %v23_v4 }
  0x8f   :  { %v25_v6 = vmul.f32 1.442695, %v24_v5 }
  0x91   :  { %123 = vpow2.f32 %v25_v6 }
  0x9e   :  { %v124_v7 = vpop.eup %123 }
  0x9f   :  { %v27_v8 = vsel %vm20_vm0, %v124_v7, 0.0 }
  0xa0   :  { %28 = vadd.xlane.f32.xlu0 %v27_v8 }
 0x129   :  { %v29_v9 = vpop.xlane.xlu0 %28 }
 0x12a   :  { %125 = vlog2.f32 %v29_v9 }
 0x12b   :  { %127 = vrcp.f32 %v29_v9 }
 0x137   :  { %v126_v13 = vpop.eup %125 }
 0x138   :  { %v128_v14 = vpop.eup %127  ;;  %v31_v15 = vmul.f32 0.6931472, %v126_v13 }
 0x139   :  { %v34_v16 = vmul.f32 %v128_v14, %v124_v7 }
 0x13a   :  { %v32_v17 = vsub.f32 %v24_v5, %v31_v15 }
 0x13b   :  { %v35_v18 = vsub.f32 1.0, %v34_v16 }
 0x13c   :  { %v55_v19 = vsel %vm54_vm1, %v32_v17, 0.0 }
 0x13d   :  { %v36_v20 = vmax.f32 %v35_v18, 0.0  ;;  %v56_v21 = vsel %vm20_vm0, %v55_v19, 0.0 }
 0x13e   :  { %57 = vadd.xlane.f32.xlu1 %v56_v21 }
 0x13f   :  { %129 = vrsqrt.f32 %v36_v20  ;;  %vm39_vm2 = vcmp.eq.f32.partialorder %v36_v20, inf  ;;  %v42_v24 = vand.u32 2147483648, %v36_v20  ;;  %vm41_vm3 = vcmp.eq.f32.partialorder %v36_v20, 0.0 }
 0x14c   :  { %v130_v22 = vpop.eup %129 }
 0x14d   :  { %v38_v23 = vmul.f32 %v130_v22, %v36_v20 }
 0x14f   :  { %v40_v25 = vsel %vm39_vm2, %v36_v20, %v38_v23 }
 0x150   :  { %v43_v26 = vsel %vm41_vm3, %v42_v24, %v40_v25 }
 0x151   :  { %v44_v27 = vmul.f32 %v43_v26, %v32_v17 }
 0x153   :  { %v45_v28 = vsel %vm20_vm0, %v44_v27, 0.0 }
 0x154   :  { %46 = vadd.xlane.f32.xlu0 %v45_v28 }
 0x1c7   :  { %v58_v29 = vpop.xlane.xlu1 %57 }
 0x1c8   :  { %v59_v30 = vmul.f32 1.442695, %v58_v29 }
 0x1ca   :  { %131 = vpow2.f32 %v59_v30 }
 0x1d7   :  { %v132_v31 = vpop.eup %131 }
 0x1d8   :  { %v61_v32 = vsub.f32 1.0, %v132_v31 }
 0x1da   :  { %v62_v33 = vmax.f32 %v61_v32, 0.0 }
 0x1dc   :  { %133 = vrsqrt.f32 %v62_v33  ;;  %vm65_vm4 = vcmp.eq.f32.partialorder %v62_v33, inf  ;;  %v68_v38 = vand.u32 2147483648, %v62_v33  ;;  %vm67_vm5 = vcmp.eq.f32.partialorder %v62_v33, 0.0 }
 0x1dd   :  { %v47_v34 = vpop.xlane.xlu0 %46 }
 0x1de   :  { %v48_v35 = vsub.f32 0.0, %v47_v34 }
 0x1e0   :  { %135 = vrcp.f32 %v48_v35 }
 0x1e9   :  { %v134_v36 = vpop.eup %133 }
 0x1ea   :  { %v64_v37 = vmul.f32 %v134_v36, %v62_v33 }
 0x1ec   :  { %v66_v39 = vsel %vm65_vm4, %v62_v33, %v64_v37 }
 0x1ed   :  { %v69_v40 = vsel %vm67_vm5, %v68_v38, %v66_v39  ;;  %v136_v43 = vpop.eup %135 }
 0x1ee   :  { %v70_v41 = vsub.f32 0.0, %v69_v40 }
 0x1f0   :  { %v71_v42 = vmul.f32 %v70_v41, %v58_v29 }
 0x1f2   :  { %v73_v44 = vmul.f32 %v136_v43, %v71_v42 }
 0x1f4   :  { %v84_v45 = vsel %vm83_vm6, %v73_v44, 0.0 }
 0x1f5   :  { %85 = vadd.xlane.f32.xlu0 %v84_v45 }
 0x27e   :  { %v86_v46 = vpop.xlane.xlu0 %85 }
 0x27f   :  { %v87_v47 = vrot.slane %v86_v46, 4 }
 0x281   :  { %v88_v48 = vadd.f32 %v87_v47, %v86_v46 }
 0x283   :  { %v89_v49 = vrot.slane %v88_v48, 2 }
 0x285   :  { %v90_v50 = vadd.f32 %v89_v49, %v88_v48 }
 0x287   :  { %v91_v51 = vrot.slane %v90_v50, 1 }
 0x289   :  { %v92_v52 = vadd.f32 %v91_v51, %v90_v50 }
 0x28b   :  { %116 = vpush %v92_v52 }
 0x2bc   :  { %s117_s0 = spop %116 }
 0x2bd   :  { %s101_s1 = smul.f32 0.125, %s117_s0 }
 0x2bf   :  { %102 = sst [smem:[#allocation2]] %s101_s1 }
 0x2c0   :  { %110 = dma.smem_to_hbm %s148_s13, 16, %s179_s2, [#allocation3]  }
 0x2c1   :  { %145 = dma.done.wait [#allocation3], 16  }
 0x2c2   :  { %146 = vsyncadd [#allocation3], 4294967280 }
 0x2c3   :  { %114 = sfence }
 0x2c4   :  { %115 = vsyncpa [#allocation3], 1 }

</bundles_post_ra>
